<compile_context>
chip_gen: v7x
topology: tpu7x:2x2x1
jax: 0.10.0
libtpu: 0.0.40
codegen_flags: <defaults>
</compile_context>

<pallas_src>
import jax
import jax.numpy as jnp
from jax.experimental import pallas as pl
from jax.experimental.pallas import tpu as pltpu

_LANE = 128      # f32 lane width
_SUBLANE = 8     # f32 sublane count


def _round_up(x, m):
    return ((x + m - 1) // m) * m


def _head_kernel(x_ref, w1_ref, b1_ref, w2_ref, b2_ref, o_ref):
    # dropout(features) -> identity at inference.
    x = x_ref[...].astype(jnp.bfloat16)                           # [TB, Din]
    # dense: x @ W1 + b1, tanh. MXU in bf16 with f32 accumulation;
    # bias + tanh stay f32 (v5e has no bf16 VPU/EUP path).
    h = jnp.dot(x, w1_ref[...], preferred_element_type=jnp.float32)
    h = jnp.tanh(h + b1_ref[...])                                  # [TB, Dh] f32
    # dropout(h) -> identity at inference.
    # out_proj: h @ W2 + b2  (W2/b2 lane-padded to a 128-wide output slab).
    o = jnp.dot(h.astype(jnp.bfloat16), w2_ref[...],
                preferred_element_type=jnp.float32)
    o_ref[...] = (o + b2_ref[...]).astype(o_ref.dtype)             # [TB, Lp]


def roberta_classification_head(features, w1, b1, w2, b2, *, block_b=256):
    """RobertaClassificationHead forward (inference; dropout = identity).

    features: [B, Din]; w1: [Din, Dh]; b1: [Dh]; w2: [Dh, L]; b2: [L].
    Weights are pre-transposed to [in, out].
    """
    B, Din = features.shape
    Dh = w1.shape[1]
    L = w2.shape[1]
    Lp = _round_up(L, _LANE)                       # lane-dense out_proj width

    # Batch tile: multiple of 8 sublanes; default 256 rows to fill the
    # 256x256 MXU on v6e/v7x when B allows, clamped for small batches.
    tb = min(block_b, _round_up(B, _SUBLANE))
    Bp = _round_up(B, tb)

    x = features.astype(jnp.float32)
    if Bp != B:
        x = jnp.pad(x, ((0, Bp - B), (0, 0)))

    # One-time wrapper-side prep: bf16 weights for the MXU, lane-padded out_proj.
    w1_bf = w1.astype(jnp.bfloat16)
    w2_bf = jnp.zeros((Dh, Lp), jnp.bfloat16).at[:, :L].set(w2.astype(jnp.bfloat16))
    b1_f = b1.reshape(1, Dh).astype(jnp.float32)
    b2_f = jnp.zeros((1, Lp), jnp.float32).at[:, :L].set(
        b2.reshape(1, L).astype(jnp.float32))

    cost = pl.CostEstimate(
        flops=2 * Bp * Din * Dh + 2 * Bp * Dh * Lp,
        transcendentals=Bp * Dh,
        bytes_accessed=(x.size * 4 + w1_bf.size * 2 + w2_bf.size * 2
                        + b1_f.size * 4 + b2_f.size * 4 + Bp * Lp * 4),
    )

    out = pl.pallas_call(
        _head_kernel,
        out_shape=jax.ShapeDtypeStruct((Bp, Lp), jnp.float32),
        grid=(Bp // tb,),
        in_specs=[
            pl.BlockSpec((tb, Din), lambda i: (i, 0)),   # features: pipelined over B
            pl.BlockSpec((Din, Dh), lambda i: (0, 0)),   # W1: VMEM-resident
            pl.BlockSpec((1, Dh), lambda i: (0, 0)),     # b1: resident
            pl.BlockSpec((Dh, Lp), lambda i: (0, 0)),    # W2 (lane-padded): resident
            pl.BlockSpec((1, Lp), lambda i: (0, 0)),     # b2 (lane-padded): resident
        ],
        out_specs=pl.BlockSpec((tb, Lp), lambda i: (i, 0)),
        compiler_params=pltpu.CompilerParams(
            dimension_semantics=("parallel",),           # shard batch tiles on v7x TCs
        ),
        cost_estimate=cost,
    )(x, w1_bf, b1_f, w2_bf, b2_f)

    return out[:B, :L]


def roberta_concat_forward(last_hidden_state, w1, b1, w2, b2):
    """RobertaForSequenceClassificationConcat.forward given the encoder output.

    Returns (features, logits) like the PyTorch module.
    """
    # TODO(synk): the pretrained RobertaModel encoder itself is not reimplemented;
    # this takes its last_hidden_state as input and covers the concat + head.
    features = last_hidden_state[:, 0, :]                        # CLS token [B, H]
    features_cat = jnp.concatenate([features, features], axis=-1)  # [B, 2H]
    logits = roberta_classification_head(features_cat, w1, b1, w2, b2)
    return features, logits


if __name__ == "__main__":
    B, S, H, L = 8, 16, 32, 2          # batch, seq_len, hidden_size, num_labels
    Din = 2 * H                        # concat-head input width (2 * hidden)

    key = jax.random.PRNGKey(0)
    k_h, k_w1, k_b1, k_w2, k_b2 = jax.random.split(key, 5)

    last_hidden_state = jax.random.normal(k_h, (B, S, H), dtype=jnp.float32)
    # dense: Linear(2H, 2H)  -> weight stored [in, out], bias [2H]
    w1 = jax.random.normal(k_w1, (Din, Din), dtype=jnp.float32) * 0.05
    b1 = jax.random.normal(k_b1, (Din,), dtype=jnp.float32) * 0.05
    # out_proj: Linear(2H, L) -> weight stored [in, out], bias [L]
    w2 = jax.random.normal(k_w2, (Din, L), dtype=jnp.float32) * 0.05
    b2 = jax.random.normal(k_b2, (L,), dtype=jnp.float32) * 0.05

    features, logits = roberta_concat_forward(last_hidden_state, w1, b1, w2, b2)
    logits = jax.block_until_ready(logits)

    # Pure-JAX f32 reference (kernel matmuls run in bf16 -> looser tolerance).
    feat_ref = last_hidden_state[:, 0, :]
    fc = jnp.concatenate([feat_ref, feat_ref], axis=-1)
    ref = jnp.tanh(fc @ w1 + b1) @ w2 + b2

    assert features.shape == (B, H) and logits.shape == (B, L)
    assert jnp.allclose(features, feat_ref)
    assert jnp.allclose(logits, ref, atol=2e-2, rtol=2e-2)

    print("KERNEL_OK")
</pallas_src>

<mosaic_0001>
module attributes {stable_mosaic.version = 11 : i64} {
  func.func @_head_kernel(%arg0: i32, %arg1: memref<8x64xf32, #tpu.memory_space<vmem>>, %arg2: memref<64x64xbf16, #tpu.memory_space<vmem>>, %arg3: memref<1x64xf32, #tpu.memory_space<vmem>>, %arg4: memref<64x128xbf16, #tpu.memory_space<vmem>>, %arg5: memref<1x128xf32, #tpu.memory_space<vmem>>, %arg6: memref<8x128xf32, #tpu.memory_space<vmem>>) attributes {dimension_semantics = [#tpu.dimension_semantics<parallel>], iteration_bounds = array<i64: 1>, scalar_prefetch = 0 : i64, scratch_operands = 0 : i64, tpu.core_type = #tpu.core_type<tc>, window_params = [{transform_indices = @transform_0, window_bounds = array<i64: 8, 64>}, {pipeline_mode = #tpu.pipeline_mode<synchronous>, transform_indices = @transform_1, window_bounds = array<i64: 64, 64>}, {pipeline_mode = #tpu.pipeline_mode<synchronous>, transform_indices = @transform_2, window_bounds = array<i64: 1, 64>}, {pipeline_mode = #tpu.pipeline_mode<synchronous>, transform_indices = @transform_3, window_bounds = array<i64: 64, 128>}, {pipeline_mode = #tpu.pipeline_mode<synchronous>, transform_indices = @transform_4, window_bounds = array<i64: 1, 128>}, {transform_indices = @transform_5, window_bounds = array<i64: 8, 128>}]} {
    %c0 = arith.constant 0 : index
    %c0_0 = arith.constant 0 : index
    %0 = vector.load %arg1[%c0, %c0_0] : memref<8x64xf32, #tpu.memory_space<vmem>>, vector<8x64xf32>
    %1 = arith.truncf %0 : vector<8x64xf32> to vector<8x64xbf16>
    %c0_1 = arith.constant 0 : index
    %c0_2 = arith.constant 0 : index
    %2 = vector.load %arg2[%c0_1, %c0_2] : memref<64x64xbf16, #tpu.memory_space<vmem>>, vector<64x64xbf16>
    %cst = arith.constant dense<0.000000e+00> : vector<8x64xf32>
    %3 = tpu.matmul %1, %2, %cst {dimension_numbers = #tpu.dot_dimension_numbers<[1], [0], [0], [1], [0, 0, 1, 1], [], []>} : vector<8x64xbf16>, vector<64x64xbf16>, vector<8x64xf32> -> vector<8x64xf32>
    %c0_3 = arith.constant 0 : index
    %c0_4 = arith.constant 0 : index
    %4 = vector.load %arg3[%c0_3, %c0_4] : memref<1x64xf32, #tpu.memory_space<vmem>>, vector<1x64xf32>
    %5 = vector.broadcast %4 : vector<1x64xf32> to vector<8x64xf32>
    %6 = arith.addf %3, %5 : vector<8x64xf32>
    %7 = math.tanh %6 : vector<8x64xf32>
    %8 = arith.truncf %7 : vector<8x64xf32> to vector<8x64xbf16>
    %c0_5 = arith.constant 0 : index
    %c0_6 = arith.constant 0 : index
    %9 = vector.load %arg4[%c0_5, %c0_6] : memref<64x128xbf16, #tpu.memory_space<vmem>>, vector<64x128xbf16>
    %cst_7 = arith.constant dense<0.000000e+00> : vector<8x128xf32>
    %10 = tpu.matmul %8, %9, %cst_7 {dimension_numbers = #tpu.dot_dimension_numbers<[1], [0], [0], [1], [0, 0, 1, 1], [], []>} : vector<8x64xbf16>, vector<64x128xbf16>, vector<8x128xf32> -> vector<8x128xf32>
    %c0_8 = arith.constant 0 : index
    %c0_9 = arith.constant 0 : index
    %11 = vector.load %arg5[%c0_8, %c0_9] : memref<1x128xf32, #tpu.memory_space<vmem>>, vector<1x128xf32>
    %12 = vector.broadcast %11 : vector<1x128xf32> to vector<8x128xf32>
    %13 = arith.addf %10, %12 : vector<8x128xf32>
    %c0_10 = arith.constant 0 : index
    %c0_11 = arith.constant 0 : index
    %14 = vector.load %arg6[%c0_10, %c0_11] : memref<8x128xf32, #tpu.memory_space<vmem>>, vector<8x128xf32>
    tpu.vector_store %arg6[%c0_10, %c0_11], %13 {strides = array<i32>} : memref<8x128xf32, #tpu.memory_space<vmem>>, vector<8x128xf32>,
    return
  }
  func.func @transform_0(%arg0: i32) -> (i32, i32) {
    %c0_i32 = arith.constant 0 : i32
    %c0_i32_0 = arith.constant 0 : i32
    return %arg0, %c0_i32 : i32, i32
  }
  func.func @transform_1(%arg0: i32) -> (i32, i32) {
    %c0_i32 = arith.constant 0 : i32
    %c0_i32_0 = arith.constant 0 : i32
    %c0_i32_1 = arith.constant 0 : i32
    return %c0_i32, %c0_i32_0 : i32, i32
  }
  func.func @transform_2(%arg0: i32) -> (i32, i32) {
    %c0_i32 = arith.constant 0 : i32
    %c0_i32_0 = arith.constant 0 : i32
    %c0_i32_1 = arith.constant 0 : i32
    return %c0_i32, %c0_i32_0 : i32, i32
  }
  func.func @transform_3(%arg0: i32) -> (i32, i32) {
    %c0_i32 = arith.constant 0 : i32
    %c0_i32_0 = arith.constant 0 : i32
    %c0_i32_1 = arith.constant 0 : i32
    return %c0_i32, %c0_i32_0 : i32, i32
  }
  func.func @transform_4(%arg0: i32) -> (i32, i32) {
    %c0_i32 = arith.constant 0 : i32
    %c0_i32_0 = arith.constant 0 : i32
    %c0_i32_1 = arith.constant 0 : i32
    return %c0_i32, %c0_i32_0 : i32, i32
  }
  func.func @transform_5(%arg0: i32) -> (i32, i32) {
    %c0_i32 = arith.constant 0 : i32
    %c0_i32_0 = arith.constant 0 : i32
    return %arg0, %c0_i32 : i32, i32
  }
}

</mosaic_0001>

<bundles_post_ra>
// kernel: tpu_custom_call.1
= control target key start
LH: loop header
LB: loop body
LE: loop exit
PB: predicated region body
PF: predicated region fallthrough
CT: control target
= control target key end

     0   :  { %10 = vsyncpa [#allocation3], 0  ;;  %s505_s0 = inlined_call_operand.hbm [shape: f32[8,64], index: 0, kind: input, shape index: {}]   ;;  %s506_s1 = inlined_call_operand.hbm [shape: bf16[64,64], index: 1, kind: input, shape index: {}]   ;;  %s507_s2 = inlined_call_operand.vmem [shape: f32[1,64], index: 2, kind: input, shape index: {}]   ;;  %s508_s3 = inlined_call_operand.hbm [shape: bf16[64,128], index: 3, kind: input, shape index: {}]   ;;  %s509_s4 = inlined_call_operand.vmem [shape: f32[1,128], index: 4, kind: input, shape index: {}]   ;;  %s510_s5 = inlined_call_operand.hbm [shape: f32[8,128], index: 5, kind: output, shape index: {}]  }
   0x1   :  { %11 = vsyncpa [#allocation6], 0 }
   0x2   :  { %12 = vsyncpa [#allocation4], 0  ;;  %s405_s18 = smov [#allocation5]   ;;  %s311_s22 = scalar_lea.hbm %s506_s1, 512 }
   0x3   :  { %s28_s19 = sshll.u32 %s405_s18, 4  ;;  %p312_p0 = scmp.ne.s32.totalorder %s506_s1, %s311_s22  ;;  %s29_s19 = int_to_ptr.vmem [resolvable:$true] %s28_s19 }
   0x4   :  { %p315_p1 = scmp.lt.u32.totalorder %s311_s22, %s506_s1 }
   0x6   :  { %p317_p2 = pnand %p315_p1, %p312_p0 }
   0x8   :  { %320 = shalt.err (!%p317_p2)
}
   0x9   :  { %s321_s27 = scalar_lea.vmem %s29_s19, 512  ;;  %p326_p4 = scmp.lt.s32.totalorder %s29_s19, %s29_s19 }
   0xa   :  { %p322_p3 = scmp.ne.s32.totalorder %s29_s19, %s321_s27  ;;  %p327_p5 = scmp.lt.s32.totalorder %s321_s27, %s321_s27 }
   0xc   :  { %p328_p6 = por %p327_p5, %p326_p4 }
   0xe   :  { %p329_p7 = pnand %p328_p6, %p322_p3 }
  0x10   :  { %332 = shalt.err (!%p329_p7)
}
  0x11   :  { %s406_s28 = smov 64   ;;  %s407_s29 = smov 4  }
  0x12   :  { %34 = dma.hbm_to_vmem [thread:$0]  %s506_s1, 512, %s29_s19, [#allocation6], %s406_s28, %s406_s28, %s407_s29  }
  0x13   :  { %s408_s7 = smov [#allocation2]   ;;  %s409_s9 = smov [#allocation7]  }
  0x14   :  { %s19_s8 = sshll.u32 %s408_s7, 4  ;;  %s42_s10 = sshll.u32 %s409_s9, 4  ;;  %s20_s8 = int_to_ptr.vmem [resolvable:$true] %s19_s8  ;;  %s43_s10 = int_to_ptr.vmem [resolvable:$true] %s42_s10 }
  0x15   :  { %s333_s13 = scalar_lea.hbm %s505_s0, 128 }
  0x16   :  { %p334_p8 = scmp.ne.s32.totalorder %s505_s0, %s333_s13  ;;  %p337_p9 = scmp.lt.u32.totalorder %s333_s13, %s505_s0 }
  0x18   :  { %p339_p10 = pnand %p337_p9, %p334_p8 }
  0x1a   :  { %342 = shalt.err (!%p339_p10)
}
  0x1b   :  { %s343_s1 = scalar_lea.vmem %s20_s8, 128  ;;  %p348_p12 = scmp.lt.s32.totalorder %s20_s8, %s20_s8 }
  0x1c   :  { %p344_p11 = scmp.ne.s32.totalorder %s20_s8, %s343_s1  ;;  %p349_p13 = scmp.lt.s32.totalorder %s343_s1, %s343_s1 }
  0x1e   :  { %p350_p0 = por %p349_p13, %p348_p12 }
  0x20   :  { %p351_p1 = pnand %p350_p0, %p344_p11 }
  0x22   :  { %354 = shalt.err (!%p351_p1)
}
  0x23   :  { %22 = dma.hbm_to_vmem [thread:$0]  %s505_s0, 128, %s20_s8, [#allocation3]  }
  0x24   :  { %s355_s22 = scalar_lea.hbm %s508_s3, 512 }
  0x25   :  { %p356_p2 = scmp.ne.s32.totalorder %s508_s3, %s355_s22  ;;  %p359_p3 = scmp.lt.u32.totalorder %s355_s22, %s508_s3 }
  0x27   :  { %p361_p4 = pnand %p359_p3, %p356_p2 }
  0x29   :  { %364 = shalt.err (!%p361_p4)
}
  0x2a   :  { %s365_s27 = scalar_lea.vmem %s43_s10, 512  ;;  %p370_p6 = scmp.lt.s32.totalorder %s43_s10, %s43_s10 }
  0x2b   :  { %p366_p5 = scmp.ne.s32.totalorder %s43_s10, %s365_s27  ;;  %p371_p7 = scmp.lt.s32.totalorder %s365_s27, %s365_s27 }
  0x2d   :  { %p372_p8 = por %p371_p7, %p370_p6 }
  0x2f   :  { %p373_p9 = pnand %p372_p8, %p366_p5 }
  0x31   :  { %376 = shalt.err (!%p373_p9)
}
  0x32   :  { %48 = dma.hbm_to_vmem [thread:$0]  %s508_s3, 512, %s43_s10, [#allocation6], %s406_s28, %s406_s28, %s407_s29  }
  0x33   :  { %399 = dma.done.wait [#allocation3], 128  }
  0x34   :  { %400 = vsyncadd [#allocation3], 4294967168 }
  0x35   :  { %401 = dma.done.wait [#allocation6], 1024  }
  0x36   :  { %402 = vsyncadd [#allocation6], 4294966272  ;;  %v410_v0 = vmov 0.0   ;;  %vm411_vm0 = vmmov 0   ;;  %v301_v1 = vld [vmem:[#allocation5] sm:$0xff]   ;;  %v302_v2 = vld [vmem:[#allocation5 + $0x8] sm:$0xff]  }
  0x37   :  { %269 = vmatprep.subr.bf16.mxu0 %v410_v0  ;;  %277 = vmatprep.mubr.msk.bf16.mxu0 %vm411_vm0, %v410_v0  ;;  %v303_v3 = vld [vmem:[#allocation5 + $0x10] sm:$0xff]   ;;  %v304_v4 = vld [vmem:[#allocation5 + $0x18] sm:$0xff]   ;;  %vm102_vm1 = vcmask 523264   ;;  %v305_v7 = vld [vmem:[#allocation7] sm:$0xff]   ;;  %s412_s7 = smov [#allocation8]  }
  0x38   :  { %281 = vmatprep.subr.bf16.mxu1 %v410_v0  ;;  %289 = vmatprep.mubr.msk.bf16.mxu1 %vm411_vm0, %v410_v0  ;;  %v61_v5 = vld [vmem:[#allocation2] sm:$0xff]  ;;  %v306_v8 = vld [vmem:[#allocation7 + $0x8] sm:$0xff]   ;;  %v307_v9 = vld [vmem:[#allocation7 + $0x10] sm:$0xff]   ;;  %s237_s8 = sshll.u32 %s412_s7, 4  ;;  %s238_s8 = int_to_ptr.vmem [resolvable:$true] %s237_s8 }
  0x39   :  { %270 = vmatpush3.bf16.msra.mxu0 %v301_v1  ;;  %v62_v6 = vpack.c.bf16 %v61_v5, %v61_v5  ;;  %282 = vmatpush3.bf16.msra.mxu1 %v305_v7  ;;  %v308_v10 = vld [vmem:[#allocation7 + $0x18] sm:$0xff]   ;;  %p382_p11 = scmp.lt.s32.totalorder %s238_s8, %s238_s8 }
  0x3a   :  { %271 = vmatprep.subr.bf16.mxu0 %v410_v0  ;;  %283 = vmatprep.subr.bf16.mxu1 %v410_v0  ;;  %v247_v11 = vld [vmem:[%s507_s2] ss:$0 sm:$0xff]  ;;  %s377_s2 = scalar_lea.vmem %s238_s8, 128 }
  0x3b   :  { %v253_v19 = vld [vmem:[%s509_s4] ss:$0 sm:$0xff]  ;;  %p378_p10 = scmp.ne.s32.totalorder %s238_s8, %s377_s2  ;;  %p383_p12 = scmp.lt.s32.totalorder %s377_s2, %s377_s2 }
  0x3d   :  { %272 = vmatpush3.bf16.msra.mxu0 %v302_v2  ;;  %284 = vmatpush3.bf16.msra.mxu1 %v306_v8  ;;  %p384_p13 = por %p383_p12, %p382_p11 }
  0x3e   :  { %273 = vmatprep.subr.bf16.mxu0 %v410_v0  ;;  %285 = vmatprep.subr.bf16.mxu1 %v410_v0 }
  0x3f   :  { %p385_p0 = pnand %p384_p13, %p378_p10 }
  0x41   :  { %274 = vmatpush3.bf16.msra.mxu0 %v303_v3  ;;  %286 = vmatpush3.bf16.msra.mxu1 %v307_v9 }
  0x42   :  { %275 = vmatprep.subr.bf16.mxu0 %v410_v0  ;;  %287 = vmatprep.subr.bf16.mxu1 %v410_v0 }
  0x45   :  { %276 = vmatpush3.bf16.msra.mxu0 %v304_v4  ;;  %288 = vmatpush3.bf16.msra.mxu1 %v308_v10 }
  0x48   :  { %278 = vmatmul.mubr.msk.bf16.vlgmr.msra.gmra.mrb[0].mxu0 %vm102_vm1, %v62_v6 }
 0x11b   :  { %v140_v12 = vpop.f32.mrb[0].mxu0 }
 0x11c   :  { %v141_v13 = vadd.f32 %v247_v11, %v140_v12  ;;  %v279_v14 = vpop.f32.mrb[1].mxu0 }
 0x11d   :  { %v143_v15 = vpop.f32.mrb[2].mxu0 }
 0x11e   :  { %309 = vtanh.f32 %v141_v13  ;;  %v280_v16 = vpop.f32.mrb[3].mxu0 }
 0x128   :  { %v310_v17 = vpop.eup %309 }
 0x129   :  { %v147_v18 = vpack.c.bf16 %v310_v17, %v310_v17 }
 0x12b   :  { %290 = vmatmul.mubr.msk.bf16.vlgmr.msra.gmra.mrb[0].mxu1 %vm102_vm1, %v147_v18 }
 0x1fe   :  { %v224_v20 = vpop.f32.mrb[0].mxu1 }
 0x1ff   :  { %v225_v21 = vadd.f32 %v253_v19, %v224_v20  ;;  %v291_v22 = vpop.f32.mrb[1].mxu1 }
 0x200   :  { %v227_v23 = vpop.f32.mrb[2].mxu1 }
 0x201   :  { %230 = vst [vmem:[#allocation8] sm:$0xff] %v225_v21  ;;  %v292_v24 = vpop.f32.mrb[3].mxu1 }
 0x202   :  { %388 = shalt.err (!%p385_p0)
}
 0x203   :  { %s389_s4 = scalar_lea.hbm %s510_s5, 128 }
 0x204   :  { %p390_p1 = scmp.ne.s32.totalorder %s510_s5, %s389_s4  ;;  %p393_p2 = scmp.lt.u32.totalorder %s389_s4, %s510_s5 }
 0x206   :  { %p395_p3 = pnand %p393_p2, %p390_p1 }
 0x208   :  { %398 = shalt.err (!%p395_p3)
}
 0x209   :  { %240 = dma.vmem_to_hbm [thread:$0]  %s238_s8, 128, %s510_s5, [#allocation4]  }
 0x20a   :  { %403 = dma.done.wait [#allocation4], 128  }
 0x20b   :  { %404 = vsyncadd [#allocation4], 4294967168 }
 0x20c   :  { %244 = vsyncpa [#allocation3], 1 }
 0x20d   :  { %245 = vsyncpa [#allocation6], 1 }
 0x20e   :  { %246 = vsyncpa [#allocation4], 1 }

</bundles_post_ra>
